<compile_context>
chip_gen: v5e
topology: v5e:2x2
jax: 0.10.0
libtpu: 0.0.40
codegen_flags: <defaults>
</compile_context>

<pallas_src>
import numpy as np
import jax
import jax.numpy as jnp
from jax.experimental import pallas as pl
from jax.experimental.pallas import tpu as pltpu


def make_normalized_hadamard(dim):
    """Sylvester-construction Hadamard matrix, normalized by 2**(log2(dim)/2)."""
    n = int(np.log2(dim))
    assert 2 ** n == dim, "Hadamard_Transform requires dim to be a power of 2"
    h = np.array([[1.0]], dtype=np.float32)
    for _ in range(n):
        h = np.block([[h, h], [h, -h]]).astype(np.float32)
    h = h / (2.0 ** (n / 2.0))
    return jnp.asarray(h, dtype=jnp.float32)


def _hadamard_left_matmul_kernel(w_ref, x_ref, o_ref):
    # w_ref: (C, C) = hadamard_matrix^T, resident across all grid steps.
    # x_ref: (C, ts) spatial tile of one image in native NCHW layout
    #        (spatial positions along the lanes -> lane-dense).
    # o_ref: (C, ts) output tile.
    o_ref[...] = jnp.dot(
        w_ref[...], x_ref[...], preferred_element_type=jnp.float32
    ).astype(o_ref.dtype)


def _pick_spatial_tile(S, C, itemsize, tile_budget_bytes=2 << 20):
    """Largest lane-dense spatial tile (multiple of 128) within a VMEM budget."""
    if S <= 128:
        return S                                  # one full tile (== array dim)
    ts = (tile_budget_bytes // (C * itemsize)) // 128 * 128
    ts = int(max(128, min(ts, 2048)))
    ts = min(ts, pl.cdiv(S, 128) * 128)           # don't tile wider than padded S
    return ts


def hadamard_transform(x_nchw, hadamard_matrix):
    """Forward of Hadamard_Transform on NCHW input (matches the PyTorch module).

    Computed as out[n, :, s] = W^T @ x[n, :, s] on the native (N, C, H*W) view,
    so no NCHW<->NHWC relayout passes are needed. (The Hadamard matrix is
    symmetric, but we transpose the tiny (C, C) weight once in the wrapper so
    arbitrary learned weights remain exactly correct.)
    """
    N, C, H, W = x_nchw.shape
    assert hadamard_matrix.shape == (C, C)
    S = H * W
    itemsize = jnp.dtype(x_nchw.dtype).itemsize

    # (N, C, H, W) -> (N, C, S): contiguous-dim reshape, no data movement.
    x = x_nchw.reshape(N, C, S)
    w_t = jnp.transpose(hadamard_matrix).astype(x.dtype)

    ts = _pick_spatial_tile(S, C, itemsize)
    grid = (N, pl.cdiv(S, ts))

    # Rough VMEM need: double-buffered in/out tiles + (double-buffered) weight.
    est_vmem = 4 * C * ts * itemsize + 2 * C * C * itemsize
    vmem_limit = int(min(max(2 * est_vmem, 32 * 2**20), 56 * 2**20))

    cost = pl.CostEstimate(
        flops=2 * N * S * C * C,
        bytes_accessed=(2 * N * C * S + C * C) * itemsize,
        transcendentals=0,
    )

    out = pl.pallas_call(
        _hadamard_left_matmul_kernel,
        out_shape=jax.ShapeDtypeStruct((N, C, S), x.dtype),
        grid_spec=pltpu.PrefetchScalarGridSpec(
            num_scalar_prefetch=0,
            grid=grid,
            in_specs=[
                pl.BlockSpec((C, C), lambda n, s: (0, 0)),            # W^T, resident
                pl.BlockSpec((None, C, ts), lambda n, s: (n, 0, s)),  # activation tile
            ],
            out_specs=pl.BlockSpec((None, C, ts), lambda n, s: (n, 0, s)),
        ),
        compiler_params=pltpu.CompilerParams(
            dimension_semantics=("parallel", "parallel"),
            vmem_limit_bytes=vmem_limit,
        ),
        cost_estimate=cost,
    )(w_t, x)

    # (N, C, S) -> (N, C, H, W): contiguous-dim reshape, no data movement.
    return out.reshape(N, C, H, W)


if __name__ == "__main__":
    # Small, module-consistent shapes: NCHW with C a power of 2.
    N, C, H, W = 2, 4, 16, 16
    key = jax.random.PRNGKey(0)
    x = jax.random.normal(key, (N, C, H, W), dtype=jnp.float32)

    hadamard_matrix = make_normalized_hadamard(C)  # deterministic parameter init

    out = hadamard_transform(x, hadamard_matrix)
    out = jax.block_until_ready(out)

    # Reference check (pure JAX, mirrors the PyTorch forward exactly).
    ref = jnp.einsum("nchw,cd->ndhw", x, hadamard_matrix)
    assert out.shape == (N, C, H, W)
    np.testing.assert_allclose(np.asarray(out), np.asarray(ref), rtol=1e-5, atol=1e-5)

    print("KERNEL_OK")
</pallas_src>

<mosaic_0001>
module attributes {stable_mosaic.version = 11 : i64} {
  func.func @_hadamard_left_matmul_kernel(%arg0: i32, %arg1: i32, %arg2: memref<4x4xf32, #tpu.memory_space<vmem>>, %arg3: memref<1x4x256xf32, #tpu.memory_space<vmem>>, %arg4: memref<1x4x256xf32, #tpu.memory_space<vmem>>) attributes {dimension_semantics = [#tpu.dimension_semantics<parallel>, #tpu.dimension_semantics<parallel>], iteration_bounds = array<i64: 2, 1>, scalar_prefetch = 0 : i64, scratch_operands = 0 : i64, tpu.core_type = #tpu.core_type<tc>, window_params = [{pipeline_mode = #tpu.pipeline_mode<synchronous>, transform_indices = @transform_0, window_bounds = array<i64: 4, 4>}, {transform_indices = @transform_1, window_bounds = array<i64: 1, 4, 256>}, {transform_indices = @transform_2, window_bounds = array<i64: 1, 4, 256>}]} {
    %c0 = arith.constant 0 : index
    %c0_0 = arith.constant 0 : index
    %0 = vector.load %arg2[%c0, %c0_0] : memref<4x4xf32, #tpu.memory_space<vmem>>, vector<4x4xf32>
    %c0_1 = arith.constant 0 : index
    %c0_2 = arith.constant 0 : index
    %c0_3 = arith.constant 0 : index
    %1 = vector.load %arg3[%c0_1, %c0_2, %c0_3] : memref<1x4x256xf32, #tpu.memory_space<vmem>>, vector<1x4x256xf32>
    %2 = vector.shape_cast %1 : vector<1x4x256xf32> to vector<4x256xf32>
    %cst = arith.constant dense<0.000000e+00> : vector<4x256xf32>
    %3 = tpu.matmul %0, %2, %cst {dimension_numbers = #tpu.dot_dimension_numbers<[1], [0], [0], [1], [0, 0, 1, 1], [], []>} : vector<4x4xf32>, vector<4x256xf32>, vector<4x256xf32> -> vector<4x256xf32>
    %c0_4 = arith.constant 0 : index
    %c0_5 = arith.constant 0 : index
    %c0_6 = arith.constant 0 : index
    %4 = vector.load %arg4[%c0_4, %c0_5, %c0_6] : memref<1x4x256xf32, #tpu.memory_space<vmem>>, vector<1x4x256xf32>
    %5 = vector.shape_cast %4 : vector<1x4x256xf32> to vector<4x256xf32>
    %6 = vector.shape_cast %3 : vector<4x256xf32> to vector<1x4x256xf32>
    tpu.vector_store %arg4[%c0_4, %c0_5, %c0_6], %6 {strides = array<i32>} : memref<1x4x256xf32, #tpu.memory_space<vmem>>, vector<1x4x256xf32>,
    return
  }
  func.func @transform_0(%arg0: i32, %arg1: i32) -> (i32, i32) {
    %c0_i32 = arith.constant 0 : i32
    %c0_i32_0 = arith.constant 0 : i32
    %c0_i32_1 = arith.constant 0 : i32
    return %c0_i32, %c0_i32_0 : i32, i32
  }
  func.func @transform_1(%arg0: i32, %arg1: i32) -> (i32, i32, i32) {
    %c0_i32 = arith.constant 0 : i32
    %c0_i32_0 = arith.constant 0 : i32
    return %arg0, %c0_i32, %arg1 : i32, i32, i32
  }
  func.func @transform_2(%arg0: i32, %arg1: i32) -> (i32, i32, i32) {
    %c0_i32 = arith.constant 0 : i32
    %c0_i32_0 = arith.constant 0 : i32
    return %arg0, %c0_i32, %arg1 : i32, i32, i32
  }
}

</mosaic_0001>

<bundles_post_ra>
// kernel: tpu_custom_call.1
= control target key start
LH: loop header
LB: loop body
LE: loop exit
PB: predicated region body
PF: predicated region fallthrough
CT: control target
= control target key end

     0   :  { %7 = vsyncpa [#allocation3], 0  ;;  %s785_s0 = inlined_call_operand.hbm [shape: f32[4,4], index: 0, kind: input, shape index: {}]   ;;  %s786_s1 = inlined_call_operand.hbm [shape: f32[2,4,256], index: 1, kind: input, shape index: {}]   ;;  %s787_s2 = inlined_call_operand.hbm [shape: f32[2,4,256], index: 2, kind: output, shape index: {}]  }
   0x1   :  { %8 = vsyncpa [#allocation6], 0 }
   0x2   :  { %10 = vsyncpa [#allocation6 + $0x1], 0 }
   0x3   :  { %11 = vsyncpa [#allocation4], 0 }
   0x4   :  { %13 = vsyncpa [#allocation4 + $0x1], 0  ;;  %s633_s9 = smov 0   ;;  %s635_s10 = smov 0  }
   0x5   :  { %s637_s11 = smov 0   ;;  %s639_s12 = smov 0  }
   0x6   :  { %s641_s13 = smov 0   ;;  %s643_s14 = smov 0  }
   0x7 LB: > { %s373_s15 = sadd.s32 4294967295, %s615_s14   ;;  %s374_s16 = sadd.s32 4294967294, %s615_s14   ;;  %s615_s14 = sphi %s643_s14, %s19_s14   ;;  %s611_s13 = sphi %s641_s13, %s799_s13   ;;  %s607_s12 = sphi %s639_s12, %s798_s12   ;;  %s603_s11 = sphi %s637_s11, %s797_s11   ;;  %s599_s10 = sphi %s635_s10, %s796_s10   ;;  %s595_s9 = sphi %s633_s9, %s795_s9  }
   0x8   : > { %p74_p0 = scmp.ne.s32.totalorder %s599_s10, %s595_s9  ;;  %p667_p1 = scmp.eq.s32.totalorder %s373_s15, 0 }
   0x9   : > { %p671_p2 = scmp.eq.s32.totalorder %s373_s15, 1  ;;  %p106_p3 = scmp.eq.s32.totalorder %s374_s16, 1 }
   0xa   : > { %p677_p4 = por %p667_p1, %p74_p0  ;;  %p375_p5 = scmp.ge.s32.totalorder %s615_s14, 1 }
   0xb   : > { %p682_p6 = por %p106_p3, %p74_p0  ;;  %p113_p7 = scmp.lt.s32.totalorder %s615_s14, 3 }
   0xc   : > { %s125_s23 = sshll.u32 %s785_s0, 4  ;;  %p377_p9 = scmp.ge.s32.totalorder %s615_s14, 2  ;;  %s126_s23 = int_to_ptr.hbm [resolvable:$true] %s125_s23 }
   0xd   : > { %p690_p8 = pnand %p375_p5, %p113_p7  ;;  %s617_s25 = smov [#allocation2]  }
   0xe   : > { %s127_s26 = sshll.u32 %s617_s25, 4  ;;  %s31_s27 = sadd.s32 1, %s611_s13  ;;  %s128_s26 = int_to_ptr.vmem [resolvable:$true] %s127_s26 }
   0xf   : > { %p404_p10 = pneg %p690_p8  ;;  %p33_p12 = scmp.ge.s32.totalorder %s31_s27, 2 }
  0x10   : > { %s61_s28 = sadd.s32 1, %s603_s11  ;;  %p68_p13 = scmp.ne.s32.totalorder %s603_s11, %s599_s10 }
  0x11   : > { %p405_p11 = pnand %p404_p10, %p667_p1  ;;  %p69_p0 = scmp.eq.s32.totalorder %s615_s14, 0 }
  0x12   : > { %s801_s27 = smov (%p33_p12, %s31_s27), 0  ;;  %p712_p5 = por %p671_p2, %p68_p13 }
  0x13   : > { %407 = dma.hbm_to_vmem [thread:$0]  (!%p405_p11), %s126_s23, 64, %s128_s26, [#allocation3]  }
  0x14   : > { %p706_p3 = por %p69_p0, %p68_p13  ;;  %s56_s3 = ssub.s32 %s611_s13, %s801_s27 }
  0x15   : > { %p417_p7 = scmp.lt.s32.totalorder %s615_s14, 2  ;;  %p59_p10 = scmp.eq.s32.totalorder %s56_s3, 0 }
  0x16   : > { %s138_s4 = sand.u32 1, %s603_s11   ;;  %s394_s7 = sshll.u32 %s611_s13, 3 }
  0x17   : > { %s378_s5 = sshll.u32 %s138_s4, 3  ;;  %s149_s16 = scalar_lea.hbm %s786_s1, %s394_s7 }
  0x18   : > { %s721_s6 = scalar_select %p59_p10, %s603_s11, %s61_s28  }
  0x19   : > { %s142_s21 = scalar_lea.vmem [#allocation5], %s378_s5  ;;  %s151_s18 = sshll.u32 %s149_s16, 4  ;;  %s152_s18 = int_to_ptr.hbm [resolvable:$true] %s151_s18 }
  0x1a   : > { %s153_s22 = sshll.u32 %s142_s21, 4  ;;  %p409_p2 = pnand %p417_p7, %p706_p3  ;;  %s154_s22 = int_to_ptr.vmem [resolvable:$true] %s153_s22 }
  0x1b   : > { %s139_s23 = scalar_lea.sflag [#allocation6], %s138_s4  ;;  %162 = sbr.rel (%p690_p8) target bundleno = 179 (0xb3), region = 28 }
  0x1c   : > { %411 = dma.hbm_to_vmem [thread:$0]  (!%p409_p2), %s152_s18, 128, %s154_s22, %s139_s23  }
  0x20   : > { %582 = dma.done.wait (%p667_p1), [#allocation3], 64  }
  0x21   : > { %584 = vsyncadd (%p667_p1), [#allocation3], 4294967232  ;;  %s736_s25 = sand.u32 1, %s599_s10  }
  0x22   : > { %s383_s26 = sshll.u32 %s736_s25, 3  ;;  %s170_s28 = scalar_lea.sflag [#allocation6], %s736_s25 }
  0x23   : > { %s173_s29 = scalar_lea.vmem [#allocation5], %s383_s26 }
  0x24   : > { %586 = dma.done.wait (%p677_p4), %s170_s28, 128  }
  0x25   : > { %588 = vsyncadd (%p677_p4), %s170_s28, 4294967168  ;;  %v198_v0 = vld [vmem:[%s173_s29] sm:$0xff]  ;;  %vm207_vm0 = vcmask 1043456   ;;  %v197_v1 = vld [vmem:[#allocation2] sm:$0xf]  ;;  %vm203_vm1 = vcmask 31744  }
  0x26   : > { %200 = vst [vmem:[#allocation1] ss:$2 sm:$0xff] %v198_v0  ;;  %s395_s17 = sshll.u32 %s607_s12, 3  ;;  %s194_s4 = scalar_lea.vmem [#allocation7], %s383_s26 }
  0x27   : > { %s272_s19 = scalar_lea.hbm %s787_s2, %s395_s17  ;;  %s274_s5 = sshll.u32 %s194_s4, 4  ;;  %s275_s5 = int_to_ptr.vmem [resolvable:$true] %s274_s5 }
  0x28   : > { %s276_s7 = sshll.u32 %s272_s19, 4  ;;  %s259_s8 = scalar_lea.sflag [#allocation4], %s736_s25  ;;  %s277_s7 = int_to_ptr.hbm [resolvable:$true] %s276_s7 }
  0x29   : > { %s543_s15 = sshra.s32 %s277_s7, 4  ;;  %s549_s22 = scalar_lea.hbm %s787_s2, 16  ;;  %s544_s15 = int_to_ptr.hbm [resolvable:$true] %s543_s15 }
  0x2a   : > { %s545_s12 = scalar_lea.hbm %s544_s15, 8  ;;  %p550_p11 = scmp.lt.s32.totalorder %s544_s15, %s787_s2 }
  0x2b   : > { %p546_p1 = scmp.ne.s32.totalorder %s544_s15, %s545_s12  ;;  %p551_p12 = scmp.lt.s32.totalorder %s549_s22, %s545_s12 }
  0x2d   : > { %v202_v2 = vld.sshfl [vmem:[#allocation1 + $0x8] sm:$0xff pattern:$0x75316420]  ;;  %v201_v3 = vld.sshfl [vmem:[#allocation1] sm:$0xff pattern:$0x75316420]  ;;  %p547_p4 = pnand %p546_p1, %p712_p5  ;;  %p552_p13 = por %p551_p12, %p550_p11 }
  0x2e   : > { %387 = vmatpush.msk.msra.mxu1 %vm207_vm0, %v202_v2  ;;  %385 = vmatpush.msk.msra.mxu0 %vm207_vm0, %v201_v3 }
  0x2f   : > { %388 = vmatmul.msk.f32.vlgmr.msra.gmra.mxu1 %vm203_vm1, %v197_v1  ;;  %386 = vmatmul.msk.f32.vlgmr.msra.gmra.mxu0 %vm203_vm1, %v197_v1  ;;  %p548_p8 = pneg %p547_p4 }
  0x31   : > { %p553_p0 = pnand %p552_p13, %p548_p8 }
  0xac   : > { %v249_v4 = vpop.f32.mrf.mxu1  ;;  %v229_v5 = vpop.f32.mrf.mxu0 }
  0xad   : > { %v254_v6 = vrot.slane %v249_v4, 4 }
  0xaf   : > { %v255_v7 = vsel %vm207_vm0, %v229_v5, %v254_v6 }
  0xb0   : > { %257 = vst [vmem:[%s194_s4] sm:$0xff] %v255_v7 }
  0xb1   : > { %556 = shalt.err (!%p553_p0)
}
  0xb2   : > { %402 = dma.vmem_to_hbm [thread:$0]  (%p712_p5), %s275_s5, 128, %s277_s7, %s259_s8  }
  0xb3 PF: > { %s288_s25 = sand.u32 1, %s595_s9   ;;  %p413_p3 = pnand %p377_p9, %p682_p6 }
  0xb4   : > { %s289_s26 = scalar_lea.sflag [#allocation4], %s288_s25 }
  0xb5   : > { %p414_p7 = pneg %p413_p3 }
  0xb7   : > { %590 = dma.done.wait (%p414_p7), %s289_s26, 128  }
  0xb8   : > { %592 = vsyncadd (%p414_p7), %s289_s26, 4294967168  ;;  %s19_s14 = sadd.s32 1, %s615_s14   ;;  %s795_s9 = smov %s599_s10 }
  0xb9   : > { %p16_p10 = scmp.ge.s32.totalorder %s19_s14, 4   ;;  %s796_s10 = smov %s603_s11 }
  0xba   : > { %s797_s11 = smov %s721_s6  ;;  %s798_s12 = smov %s611_s13 }
  0xbb   : > { %s799_s13 = smov %s801_s27  ;;  %18 = sbr.rel (!%p16_p10) target bundleno = 7 (0x7), region = 78 }
  0xc0   :  { %295 = vsyncpa [#allocation3], 1 }
  0xc1   :  { %297 = vsyncpa [#allocation3 + $0x1], 1 }
  0xc2   :  { %298 = vsyncpa [#allocation6], 1 }
  0xc3   :  { %300 = vsyncpa [#allocation6 + $0x1], 1 }
  0xc4   :  { %301 = vsyncpa [#allocation4], 1 }
  0xc5   :  { %303 = vsyncpa [#allocation4 + $0x1], 1 }

</bundles_post_ra>
